<compile_context>
chip_gen: v7x
topology: tpu7x:2x2x1
jax: 0.10.0
libtpu: 0.0.40
codegen_flags: <defaults>
</compile_context>

<pallas_src>
import functools

import jax
import jax.numpy as jnp
from jax import lax
from jax.experimental import pallas as pl
from jax.experimental.pallas import tpu as pltpu


_NEG_BIG = -1e9    # finite "-inf" for padded softmax lanes (avoids 0 * inf = NaN)
_HEAD_PAD = 128    # lane-dense padded width of the softmax head / outputs


def _controller_kernel(n_layers, batch_p, hidden,
                       gumbel_ref,                     # (L, Bp, 128) f32
                       w_gate_ref, b_gate_ref,         # (2H, 4H) bf16, (1, 4H) f32
                       w_out_ref, b_out_ref,           # (H, 128) bf16, (1, 128) f32
                       probs_ref, actions_ref,         # (L, Bp, 128) f32 / int32
                       logp_ref, ent_ref):             # (Bp, 128) f32 each
    H = hidden
    NBp = _HEAD_PAD

    # Hoist weight loads out of the unrolled layer loop (stay vreg/VMEM resident).
    w_gate = w_gate_ref[...]        # rows 0..H-1: E' = emb @ W_ih (zero-padded),
    b_gate = b_gate_ref[...]        # rows H..2H-1: W_hh   (gate order i,f,g,o)
    w_out = w_out_ref[...]
    b_out = b_out_ref[...]

    lane_nb = lax.broadcasted_iota(jnp.int32, (batch_p, NBp), 1)
    lane_h = lax.broadcasted_iota(jnp.int32, (batch_p, H), 1)

    one_hot = jnp.zeros((batch_p, H), jnp.float32)   # layer-0 input embed == 0
    h = jnp.zeros((batch_p, H), jnp.float32)
    c = jnp.zeros((batch_p, H), jnp.float32)
    logp_sum = jnp.zeros((batch_p, 1), jnp.float32)
    ent_sum = jnp.zeros((batch_p, 1), jnp.float32)

    for l in range(n_layers):        # n_layers is static & small -> unrolled
        # ---- fused LSTMCell: one matmul produces all four gates (i, f, g, o).
        # Embedding lookup is folded into w_gate, so the input is just
        # [one_hot_prev_action | h] of width 2H (== 128 lanes for H=64).
        x = jnp.concatenate([one_hot, h], axis=-1).astype(jnp.bfloat16)
        gates = jnp.dot(x, w_gate, preferred_element_type=jnp.float32) + b_gate
        i_g = jax.nn.sigmoid(gates[:, 0 * H:1 * H])
        f_g = jax.nn.sigmoid(gates[:, 1 * H:2 * H])
        g_g = jnp.tanh(gates[:, 2 * H:3 * H])
        o_g = jax.nn.sigmoid(gates[:, 3 * H:4 * H])
        c = f_g * c + i_g * g_g
        h = o_g * jnp.tanh(c)

        # ---- linear head (lane-padded to 128) + stable softmax / log-softmax.
        logits = (jnp.dot(h.astype(jnp.bfloat16), w_out,
                          preferred_element_type=jnp.float32) + b_out)
        m = jnp.max(logits, axis=-1, keepdims=True)
        ex = jnp.exp(logits - m)
        denom = jnp.sum(ex, axis=-1, keepdims=True)
        probs = ex / denom                                   # padded lanes -> 0
        log_probs = (logits - m) - jnp.log(denom)            # padded lanes ~ -1e9

        # ---- categorical sample via Gumbel-max (noise precomputed outside).
        z = log_probs + gumbel_ref[l]
        zmax = jnp.max(z, axis=-1, keepdims=True)
        action = jnp.min(jnp.where(z >= zmax, lane_nb, NBp),
                         axis=-1, keepdims=True)             # (Bp, 1) int32, < NB

        # ---- log-prob of sampled action, entropy (padded lanes contribute 0).
        sel_logp = jnp.sum(jnp.where(lane_nb == action, log_probs, 0.0),
                           axis=-1, keepdims=True)
        entropy = -jnp.sum(probs * log_probs, axis=-1, keepdims=True)
        logp_sum = logp_sum + sel_logp
        ent_sum = ent_sum + entropy

        probs_ref[l] = probs
        actions_ref[l] = jnp.broadcast_to(action, (batch_p, NBp))

        # next layer's LSTM input selector (embedding already folded into w_gate)
        one_hot = (lane_h == action).astype(jnp.float32)

    logp_ref[...] = jnp.broadcast_to(logp_sum, (batch_p, NBp))
    ent_ref[...] = jnp.broadcast_to(ent_sum, (batch_p, NBp))


class WABEControllerDistPallas:
    def __init__(self, n_layers, bits=(2, 3, 4, 5, 6, 7, 8), hidden_size=64,
                 batch_size=1, init_range=0.1, key=None):
        self.n_layers = int(n_layers)
        self.bits = list(bits)
        self.n_bits = len(self.bits)
        self.hidden_size = int(hidden_size)
        self.batch_size = int(batch_size)
        assert self.n_bits <= self.hidden_size and self.n_bits <= _HEAD_PAD

        if key is None:
            key = jax.random.PRNGKey(0)
        H, NB = self.hidden_size, self.n_bits
        ks = jax.random.split(key, 7)
        u = lambda k, shape: jax.random.uniform(
            k, shape, jnp.float32, minval=-init_range, maxval=init_range)

        # PyTorch-shaped parameters, uniform(-0.1, 0.1) like reset_parameters().
        emb_w = u(ks[0], (NB, H))          # nn.Embedding(NB, H)
        w_ih = u(ks[1], (4 * H, H))        # LSTMCell.weight_ih (i,f,g,o)
        w_hh = u(ks[2], (4 * H, H))        # LSTMCell.weight_hh
        b_ih = u(ks[3], (4 * H,))
        b_hh = u(ks[4], (4 * H,))
        lin_w = u(ks[5], (NB, H))          # Linear.weight
        lin_b = u(ks[6], (NB,))            # Linear.bias

        # ---- repack / fuse for the kernel -------------------------------------
        w_ih_cat = w_ih.T                                  # (H, 4H), x @ W form
        w_hh_cat = w_hh.T                                  # (H, 4H)
        e_prime = emb_w @ w_ih_cat                         # (NB, 4H): emb folded in
        e_pad = jnp.zeros((H, 4 * H), jnp.float32).at[:NB].set(e_prime)
        self.w_gate = jnp.concatenate([e_pad, w_hh_cat], axis=0).astype(jnp.bfloat16)
        self.b_gate = (b_ih + b_hh).reshape(1, 4 * H)      # f32

        w_out = jnp.zeros((H, _HEAD_PAD), jnp.float32).at[:, :NB].set(lin_w.T)
        self.w_out = w_out.astype(jnp.bfloat16)
        self.b_out = (jnp.full((1, _HEAD_PAD), _NEG_BIG, jnp.float32)
                      .at[0, :NB].set(lin_b))

        self.bits_table = jnp.asarray(self.bits, jnp.int32)
        self.batch_p = max(8, -(-self.batch_size // 8) * 8)   # pad batch to sublanes

        self._call = self._build()
        self._forward = jax.jit(self._forward_impl)

    def _build(self):
        L, Bp = self.n_layers, self.batch_p
        kernel = functools.partial(_controller_kernel, L, Bp, self.hidden_size)
        vmem = pl.BlockSpec(memory_space=pltpu.MemorySpace.VMEM)
        return pl.pallas_call(
            kernel,
            out_shape=(
                jax.ShapeDtypeStruct((L, Bp, _HEAD_PAD), jnp.float32),  # probs
                jax.ShapeDtypeStruct((L, Bp, _HEAD_PAD), jnp.int32),    # actions
                jax.ShapeDtypeStruct((Bp, _HEAD_PAD), jnp.float32),     # sum log-prob
                jax.ShapeDtypeStruct((Bp, _HEAD_PAD), jnp.float32),     # sum entropy
            ),
            in_specs=[vmem, vmem, vmem, vmem, vmem],
            out_specs=(vmem, vmem, vmem, vmem),
        )

    def _forward_impl(self, key):
        L, B, NB, Bp = self.n_layers, self.batch_size, self.n_bits, self.batch_p
        # Gumbel noise for categorical sampling, generated outside the kernel.
        gumbel = jax.random.gumbel(key, (L, Bp, _HEAD_PAD), jnp.float32)
        probs_p, actions_p, logp_p, ent_p = self._call(
            gumbel, self.w_gate, self.b_gate, self.w_out, self.b_out)
        probs = probs_p[:, :B, :NB]                    # (L, B, NB)
        actions = actions_p[:, :B, 0]                  # (L, B) int32
        bits_seq = jnp.take(self.bits_table, actions)  # (L, B) bit values, on device
        return bits_seq, probs, logp_p[:B, 0], ent_p[:B, 0]

    def forward(self, seed=1234):
        # Returns device arrays (no host sync / Python list building):
        #   bits_seq (L,B) int32, probs (L,B,NB) f32, logp_sum (B,), ent_sum (B,)
        return self._forward(jax.random.PRNGKey(seed))


if __name__ == "__main__":
    n_layers, hidden, batch = 4, 64, 2
    ctrl = WABEControllerDistPallas(
        n_layers=n_layers, hidden_size=hidden, batch_size=batch,
        key=jax.random.PRNGKey(0))

    bits_seq, probs, logp_sum, ent_sum = ctrl.forward(seed=1234)
    jax.block_until_ready((bits_seq, probs, logp_sum, ent_sum))

    NB = ctrl.n_bits
    # probabilities normalize, shapes match, sampled bits are valid, logp/entropy signs
    assert probs.shape == (n_layers, batch, NB)
    assert bool(jnp.all(jnp.abs(jnp.sum(probs, axis=-1) - 1.0) < 1e-3))
    assert bits_seq.shape == (n_layers, batch)
    allowed = jnp.asarray(ctrl.bits, jnp.int32)
    assert bool(jnp.all(jnp.any(bits_seq[..., None] == allowed, axis=-1)))
    assert logp_sum.shape == (batch,) and ent_sum.shape == (batch,)
    assert bool(jnp.all(ent_sum > 0.0)) and bool(jnp.all(logp_sum < 0.0))

    print("KERNEL_OK")
</pallas_src>

<mosaic_0001>
module attributes {stable_mosaic.version = 11 : i64} {
  func.func @_controller_kernel(%arg0: memref<4x8x128xf32, #tpu.memory_space<vmem>>, %arg1: memref<128x256xbf16, #tpu.memory_space<vmem>>, %arg2: memref<1x256xf32, #tpu.memory_space<vmem>>, %arg3: memref<64x128xbf16, #tpu.memory_space<vmem>>, %arg4: memref<1x128xf32, #tpu.memory_space<vmem>>, %arg5: memref<4x8x128xf32, #tpu.memory_space<vmem>>, %arg6: memref<4x8x128xi32, #tpu.memory_space<vmem>>, %arg7: memref<8x128xf32, #tpu.memory_space<vmem>>, %arg8: memref<8x128xf32, #tpu.memory_space<vmem>>) attributes {dimension_semantics = [], scalar_prefetch = 0 : i64, scratch_operands = 0 : i64, tpu.core_type = #tpu.core_type<tc>} {
    %c0 = arith.constant 0 : index
    %c0_0 = arith.constant 0 : index
    %0 = vector.load %arg1[%c0, %c0_0] : memref<128x256xbf16, #tpu.memory_space<vmem>>, vector<128x256xbf16>
    %c0_1 = arith.constant 0 : index
    %c0_2 = arith.constant 0 : index
    %1 = vector.load %arg2[%c0_1, %c0_2] : memref<1x256xf32, #tpu.memory_space<vmem>>, vector<1x256xf32>
    %c0_3 = arith.constant 0 : index
    %c0_4 = arith.constant 0 : index
    %2 = vector.load %arg3[%c0_3, %c0_4] : memref<64x128xbf16, #tpu.memory_space<vmem>>, vector<64x128xbf16>
    %c0_5 = arith.constant 0 : index
    %c0_6 = arith.constant 0 : index
    %3 = vector.load %arg4[%c0_5, %c0_6] : memref<1x128xf32, #tpu.memory_space<vmem>>, vector<1x128xf32>
    %4 = tpu.iota {dimensions = array<i32: 1>} : vector<8x128xi32>
    %5 = tpu.iota {dimensions = array<i32: 1>} : vector<8x64xi32>
    %cst = arith.constant 0.000000e+00 : f32
    %6 = vector.broadcast %cst : f32 to vector<8x64xf32>
    %cst_7 = arith.constant 0.000000e+00 : f32
    %7 = vector.broadcast %cst_7 : f32 to vector<8x64xf32>
    %cst_8 = arith.constant 0.000000e+00 : f32
    %8 = vector.broadcast %cst_8 : f32 to vector<8x64xf32>
    %cst_9 = arith.constant 0.000000e+00 : f32
    %9 = vector.broadcast %cst_9 : f32 to vector<8x1xf32>
    %cst_10 = arith.constant 0.000000e+00 : f32
    %10 = vector.broadcast %cst_10 : f32 to vector<8x1xf32>
    %11 = tpu.concatenate %6, %7 in 1 : vector<8x64xf32>, vector<8x64xf32> -> vector<8x128xf32>
    %12 = arith.truncf %11 : vector<8x128xf32> to vector<8x128xbf16>
    %cst_11 = arith.constant dense<0.000000e+00> : vector<8x256xf32>
    %13 = tpu.matmul %12, %0, %cst_11 {dimension_numbers = #tpu.dot_dimension_numbers<[1], [0], [0], [1], [0, 0, 1, 1], [], []>} : vector<8x128xbf16>, vector<128x256xbf16>, vector<8x256xf32> -> vector<8x256xf32>
    %14 = vector.broadcast %1 : vector<1x256xf32> to vector<8x256xf32>
    %15 = arith.addf %13, %14 : vector<8x256xf32>
    %16 = vector.extract_strided_slice %15 {offsets = [0, 0], sizes = [8, 64], strides = [1, 1]} : vector<8x256xf32> to vector<8x64xf32>
    %17 = arith.negf %16 : vector<8x64xf32>
    %18 = math.exp %17 : vector<8x64xf32>
    %cst_12 = arith.constant 1.000000e+00 : f32
    %19 = vector.broadcast %cst_12 : f32 to vector<8x64xf32>
    %20 = arith.addf %19, %18 : vector<8x64xf32>
    %21 = arith.divf %19, %20 : vector<8x64xf32>
    %22 = vector.extract_strided_slice %15 {offsets = [0, 64], sizes = [8, 64], strides = [1, 1]} : vector<8x256xf32> to vector<8x64xf32>
    %23 = arith.negf %22 : vector<8x64xf32>
    %24 = math.exp %23 : vector<8x64xf32>
    %cst_13 = arith.constant 1.000000e+00 : f32
    %25 = vector.broadcast %cst_13 : f32 to vector<8x64xf32>
    %26 = arith.addf %25, %24 : vector<8x64xf32>
    %27 = arith.divf %25, %26 : vector<8x64xf32>
    %28 = vector.extract_strided_slice %15 {offsets = [0, 128], sizes = [8, 64], strides = [1, 1]} : vector<8x256xf32> to vector<8x64xf32>
    %29 = math.tanh %28 : vector<8x64xf32>
    %30 = vector.extract_strided_slice %15 {offsets = [0, 192], sizes = [8, 64], strides = [1, 1]} : vector<8x256xf32> to vector<8x64xf32>
    %31 = arith.negf %30 : vector<8x64xf32>
    %32 = math.exp %31 : vector<8x64xf32>
    %cst_14 = arith.constant 1.000000e+00 : f32
    %33 = vector.broadcast %cst_14 : f32 to vector<8x64xf32>
    %34 = arith.addf %33, %32 : vector<8x64xf32>
    %35 = arith.divf %33, %34 : vector<8x64xf32>
    %36 = arith.mulf %27, %8 : vector<8x64xf32>
    %37 = arith.mulf %21, %29 : vector<8x64xf32>
    %38 = arith.addf %36, %37 : vector<8x64xf32>
    %39 = math.tanh %38 : vector<8x64xf32>
    %40 = arith.mulf %35, %39 : vector<8x64xf32>
    %41 = arith.truncf %40 : vector<8x64xf32> to vector<8x64xbf16>
    %cst_15 = arith.constant dense<0.000000e+00> : vector<8x128xf32>
    %42 = tpu.matmul %41, %2, %cst_15 {dimension_numbers = #tpu.dot_dimension_numbers<[1], [0], [0], [1], [0, 0, 1, 1], [], []>} : vector<8x64xbf16>, vector<64x128xbf16>, vector<8x128xf32> -> vector<8x128xf32>
    %43 = vector.broadcast %3 : vector<1x128xf32> to vector<8x128xf32>
    %44 = arith.addf %42, %43 : vector<8x128xf32>
    %cst_16 = arith.constant dense<0xFF800000> : vector<8xf32>
    %45 = vector.multi_reduction <maximumf>, %44, %cst_16 [1] : vector<8x128xf32> to vector<8xf32>
    %46 = vector.shape_cast %45 : vector<8xf32> to vector<8x1xf32>
    %47 = vector.broadcast %46 : vector<8x1xf32> to vector<8x128xf32>
    %48 = arith.subf %44, %47 : vector<8x128xf32>
    %49 = math.exp %48 : vector<8x128xf32>
    %cst_17 = arith.constant dense<0.000000e+00> : vector<8xf32>
    %50 = vector.multi_reduction <add>, %49, %cst_17 [1] : vector<8x128xf32> to vector<8xf32>
    %51 = vector.shape_cast %50 : vector<8xf32> to vector<8x1xf32>
    %52 = vector.broadcast %51 : vector<8x1xf32> to vector<8x128xf32>
    %53 = arith.divf %49, %52 : vector<8x128xf32>
    %54 = vector.broadcast %46 : vector<8x1xf32> to vector<8x128xf32>
    %55 = arith.subf %44, %54 : vector<8x128xf32>
    %56 = math.log %51 : vector<8x1xf32>
    %57 = vector.broadcast %56 : vector<8x1xf32> to vector<8x128xf32>
    %58 = arith.subf %55, %57 : vector<8x128xf32>
    %c0_18 = arith.constant 0 : index
    %c0_19 = arith.constant 0 : index
    %c0_20 = arith.constant 0 : index
    %59 = vector.load %arg0[%c0_18, %c0_19, %c0_20] : memref<4x8x128xf32, #tpu.memory_space<vmem>>, vector<1x8x128xf32>
    %60 = vector.shape_cast %59 : vector<1x8x128xf32> to vector<8x128xf32>
    %61 = arith.addf %58, %60 : vector<8x128xf32>
    %cst_21 = arith.constant dense<0xFF800000> : vector<8xf32>
    %62 = vector.multi_reduction <maximumf>, %61, %cst_21 [1] : vector<8x128xf32> to vector<8xf32>
    %63 = vector.shape_cast %62 : vector<8xf32> to vector<8x1xf32>
    %64 = vector.broadcast %63 : vector<8x1xf32> to vector<8x128xf32>
    %65 = arith.cmpf oge, %61, %64 : vector<8x128xf32>
    %c128_i32 = arith.constant 128 : i32
    %66 = vector.broadcast %c128_i32 : i32 to vector<8x128xi32>
    %67 = arith.select %65, %4, %66 : vector<8x128xi1>, vector<8x128xi32>
    %cst_22 = arith.constant dense<2147483647> : vector<8xi32>
    %68 = vector.multi_reduction <minsi>, %67, %cst_22 [1] : vector<8x128xi32> to vector<8xi32>
    %69 = vector.shape_cast %68 : vector<8xi32> to vector<8x1xi32>
    %70 = vector.broadcast %69 : vector<8x1xi32> to vector<8x128xi32>
    %71 = arith.cmpi eq, %4, %70 : vector<8x128xi32>
    %cst_23 = arith.constant 0.000000e+00 : f32
    %72 = vector.broadcast %cst_23 : f32 to vector<8x128xf32>
    %73 = arith.select %71, %58, %72 : vector<8x128xi1>, vector<8x128xf32>
    %cst_24 = arith.constant dense<0.000000e+00> : vector<8xf32>
    %74 = vector.multi_reduction <add>, %73, %cst_24 [1] : vector<8x128xf32> to vector<8xf32>
    %75 = vector.shape_cast %74 : vector<8xf32> to vector<8x1xf32>
    %76 = arith.mulf %53, %58 : vector<8x128xf32>
    %cst_25 = arith.constant dense<0.000000e+00> : vector<8xf32>
    %77 = vector.multi_reduction <add>, %76, %cst_25 [1] : vector<8x128xf32> to vector<8xf32>
    %78 = vector.shape_cast %77 : vector<8xf32> to vector<8x1xf32>
    %cst_26 = arith.constant 0.000000e+00 : f32
    %79 = vector.broadcast %cst_26 : f32 to vector<8x1xf32>
    %80 = arith.subf %79, %78 : vector<8x1xf32>
    %81 = arith.addf %9, %75 : vector<8x1xf32>
    %82 = arith.addf %10, %80 : vector<8x1xf32>
    %c0_27 = arith.constant 0 : index
    %c0_28 = arith.constant 0 : index
    %c0_29 = arith.constant 0 : index
    %83 = vector.load %arg5[%c0_27, %c0_28, %c0_29] : memref<4x8x128xf32, #tpu.memory_space<vmem>>, vector<1x8x128xf32>
    %84 = vector.shape_cast %83 : vector<1x8x128xf32> to vector<8x128xf32>
    %85 = vector.shape_cast %53 : vector<8x128xf32> to vector<1x8x128xf32>
    tpu.vector_store %arg5[%c0_27, %c0_28, %c0_29], %85 {strides = array<i32>} : memref<4x8x128xf32, #tpu.memory_space<vmem>>, vector<1x8x128xf32>,
    %86 = vector.shape_cast %69 : vector<8x1xi32> to vector<8x1xi32>
    %87 = vector.broadcast %86 : vector<8x1xi32> to vector<8x128xi32>
    %c0_30 = arith.constant 0 : index
    %c0_31 = arith.constant 0 : index
    %c0_32 = arith.constant 0 : index
    %88 = vector.load %arg6[%c0_30, %c0_31, %c0_32] : memref<4x8x128xi32, #tpu.memory_space<vmem>>, vector<1x8x128xi32>
    %89 = vector.shape_cast %88 : vector<1x8x128xi32> to vector<8x128xi32>
    %90 = vector.shape_cast %87 : vector<8x128xi32> to vector<1x8x128xi32>
    tpu.vector_store %arg6[%c0_30, %c0_31, %c0_32], %90 {strides = array<i32>} : memref<4x8x128xi32, #tpu.memory_space<vmem>>, vector<1x8x128xi32>,
    %91 = vector.broadcast %69 : vector<8x1xi32> to vector<8x64xi32>
    %92 = arith.cmpi eq, %5, %91 : vector<8x64xi32>
    %93 = arith.extui %92 : vector<8x64xi1> to vector<8x64xi32>
    %94 = arith.sitofp %93 : vector<8x64xi32> to vector<8x64xf32>
    %95 = tpu.concatenate %94, %40 in 1 : vector<8x64xf32>, vector<8x64xf32> -> vector<8x128xf32>
    %96 = arith.truncf %95 : vector<8x128xf32> to vector<8x128xbf16>
    %cst_33 = arith.constant dense<0.000000e+00> : vector<8x256xf32>
    %97 = tpu.matmul %96, %0, %cst_33 {dimension_numbers = #tpu.dot_dimension_numbers<[1], [0], [0], [1], [0, 0, 1, 1], [], []>} : vector<8x128xbf16>, vector<128x256xbf16>, vector<8x256xf32> -> vector<8x256xf32>
    %98 = vector.broadcast %1 : vector<1x256xf32> to vector<8x256xf32>
    %99 = arith.addf %97, %98 : vector<8x256xf32>
    %100 = vector.extract_strided_slice %99 {offsets = [0, 0], sizes = [8, 64], strides = [1, 1]} : vector<8x256xf32> to vector<8x64xf32>
    %101 = arith.negf %100 : vector<8x64xf32>
    %102 = math.exp %101 : vector<8x64xf32>
    %cst_34 = arith.constant 1.000000e+00 : f32
    %103 = vector.broadcast %cst_34 : f32 to vector<8x64xf32>
    %104 = arith.addf %103, %102 : vector<8x64xf32>
    %105 = arith.divf %103, %104 : vector<8x64xf32>
    %106 = vector.extract_strided_slice %99 {offsets = [0, 64], sizes = [8, 64], strides = [1, 1]} : vector<8x256xf32> to vector<8x64xf32>
    %107 = arith.negf %106 : vector<8x64xf32>
    %108 = math.exp %107 : vector<8x64xf32>
    %cst_35 = arith.constant 1.000000e+00 : f32
    %109 = vector.broadcast %cst_35 : f32 to vector<8x64xf32>
    %110 = arith.addf %109, %108 : vector<8x64xf32>
    %111 = arith.divf %109, %110 : vector<8x64xf32>
    %112 = vector.extract_strided_slice %99 {offsets = [0, 128], sizes = [8, 64], strides = [1, 1]} : vector<8x256xf32> to vector<8x64xf32>
    %113 = math.tanh %112 : vector<8x64xf32>
    %114 = vector.extract_strided_slice %99 {offsets = [0, 192], sizes = [8, 64], strides = [1, 1]} : vector<8x256xf32> to vector<8x64xf32>
    %115 = arith.negf %114 : vector<8x64xf32>
    %116 = math.exp %115 : vector<8x64xf32>
    %cst_36 = arith.constant 1.000000e+00 : f32
    %117 = vector.broadcast %cst_36 : f32 to vector<8x64xf32>
    %118 = arith.addf %117, %116 : vector<8x64xf32>
    %119 = arith.divf %117, %118 : vector<8x64xf32>
    %120 = arith.mulf %111, %38 : vector<8x64xf32>
    %121 = arith.mulf %105, %113 : vector<8x64xf32>
    %122 = arith.addf %120, %121 : vector<8x64xf32>
    %123 = math.tanh %122 : vector<8x64xf32>
    %124 = arith.mulf %119, %123 : vector<8x64xf32>
    %125 = arith.truncf %124 : vector<8x64xf32> to vector<8x64xbf16>
    %cst_37 = arith.constant dense<0.000000e+00> : vector<8x128xf32>
    %126 = tpu.matmul %125, %2, %cst_37 {dimension_numbers = #tpu.dot_dimension_numbers<[1], [0], [0], [1], [0, 0, 1, 1], [], []>} : vector<8x64xbf16>, vector<64x128xbf16>, vector<8x128xf32> -> vector<8x128xf32>
    %127 = vector.broadcast %3 : vector<1x128xf32> to vector<8x128xf32>
    %128 = arith.addf %126, %127 : vector<8x128xf32>
    %cst_38 = arith.constant dense<0xFF800000> : vector<8xf32>
    %129 = vector.multi_reduction <maximumf>, %128, %cst_38 [1] : vector<8x128xf32> to vector<8xf32>
    %130 = vector.shape_cast %129 : vector<8xf32> to vector<8x1xf32>
    %131 = vector.broadcast %130 : vector<8x1xf32> to vector<8x128xf32>
    %132 = arith.subf %128, %131 : vector<8x128xf32>
    %133 = math.exp %132 : vector<8x128xf32>
    %cst_39 = arith.constant dense<0.000000e+00> : vector<8xf32>
    %134 = vector.multi_reduction <add>, %133, %cst_39 [1] : vector<8x128xf32> to vector<8xf32>
    %135 = vector.shape_cast %134 : vector<8xf32> to vector<8x1xf32>
    %136 = vector.broadcast %135 : vector<8x1xf32> to vector<8x128xf32>
    %137 = arith.divf %133, %136 : vector<8x128xf32>
    %138 = vector.broadcast %130 : vector<8x1xf32> to vector<8x128xf32>
    %139 = arith.subf %128, %138 : vector<8x128xf32>
    %140 = math.log %135 : vector<8x1xf32>
    %141 = vector.broadcast %140 : vector<8x1xf32> to vector<8x128xf32>
    %142 = arith.subf %139, %141 : vector<8x128xf32>
    %c1 = arith.constant 1 : index
    %c0_40 = arith.constant 0 : index
    %c0_41 = arith.constant 0 : index
    %143 = vector.load %arg0[%c1, %c0_40, %c0_41] : memref<4x8x128xf32, #tpu.memory_space<vmem>>, vector<1x8x128xf32>
    %144 = vector.shape_cast %143 : vector<1x8x128xf32> to vector<8x128xf32>
    %145 = arith.addf %142, %144 : vector<8x128xf32>
    %cst_42 = arith.constant dense<0xFF800000> : vector<8xf32>
    %146 = vector.multi_reduction <maximumf>, %145, %cst_42 [1] : vector<8x128xf32> to vector<8xf32>
    %147 = vector.shape_cast %146 : vector<8xf32> to vector<8x1xf32>
    %148 = vector.broadcast %147 : vector<8x1xf32> to vector<8x128xf32>
    %149 = arith.cmpf oge, %145, %148 : vector<8x128xf32>
    %c128_i32_43 = arith.constant 128 : i32
    %150 = vector.broadcast %c128_i32_43 : i32 to vector<8x128xi32>
    %151 = arith.select %149, %4, %150 : vector<8x128xi1>, vector<8x128xi32>
    %cst_44 = arith.constant dense<2147483647> : vector<8xi32>
    %152 = vector.multi_reduction <minsi>, %151, %cst_44 [1] : vector<8x128xi32> to vector<8xi32>
    %153 = vector.shape_cast %152 : vector<8xi32> to vector<8x1xi32>
    %154 = vector.broadcast %153 : vector<8x1xi32> to vector<8x128xi32>
    %155 = arith.cmpi eq, %4, %154 : vector<8x128xi32>
    %cst_45 = arith.constant 0.000000e+00 : f32
    %156 = vector.broadcast %cst_45 : f32 to vector<8x128xf32>
    %157 = arith.select %155, %142, %156 : vector<8x128xi1>, vector<8x128xf32>
    %cst_46 = arith.constant dense<0.000000e+00> : vector<8xf32>
    %158 = vector.multi_reduction <add>, %157, %cst_46 [1] : vector<8x128xf32> to vector<8xf32>
    %159 = vector.shape_cast %158 : vector<8xf32> to vector<8x1xf32>
    %160 = arith.mulf %137, %142 : vector<8x128xf32>
    %cst_47 = arith.constant dense<0.000000e+00> : vector<8xf32>
    %161 = vector.multi_reduction <add>, %160, %cst_47 [1] : vector<8x128xf32> to vector<8xf32>
    %162 = vector.shape_cast %161 : vector<8xf32> to vector<8x1xf32>
    %cst_48 = arith.constant 0.000000e+00 : f32
    %163 = vector.broadcast %cst_48 : f32 to vector<8x1xf32>
    %164 = arith.subf %163, %162 : vector<8x1xf32>
    %165 = arith.addf %81, %159 : vector<8x1xf32>
    %166 = arith.addf %82, %164 : vector<8x1xf32>
    %c1_49 = arith.constant 1 : index
    %c0_50 = arith.constant 0 : index
    %c0_51 = arith.constant 0 : index
    %167 = vector.load %arg5[%c1_49, %c0_50, %c0_51] : memref<4x8x128xf32, #tpu.memory_space<vmem>>, vector<1x8x128xf32>
    %168 = vector.shape_cast %167 : vector<1x8x128xf32> to vector<8x128xf32>
    %169 = vector.shape_cast %137 : vector<8x128xf32> to vector<1x8x128xf32>
    tpu.vector_store %arg5[%c1_49, %c0_50, %c0_51], %169 {strides = array<i32>} : memref<4x8x128xf32, #tpu.memory_space<vmem>>, vector<1x8x128xf32>,
    %170 = vector.shape_cast %153 : vector<8x1xi32> to vector<8x1xi32>
    %171 = vector.broadcast %170 : vector<8x1xi32> to vector<8x128xi32>
    %c1_52 = arith.constant 1 : index
    %c0_53 = arith.constant 0 : index
    %c0_54 = arith.constant 0 : index
    %172 = vector.load %arg6[%c1_52, %c0_53, %c0_54] : memref<4x8x128xi32, #tpu.memory_space<vmem>>, vector<1x8x128xi32>
    %173 = vector.shape_cast %172 : vector<1x8x128xi32> to vector<8x128xi32>
    %174 = vector.shape_cast %171 : vector<8x128xi32> to vector<1x8x128xi32>
    tpu.vector_store %arg6[%c1_52, %c0_53, %c0_54], %174 {strides = array<i32>} : memref<4x8x128xi32, #tpu.memory_space<vmem>>, vector<1x8x128xi32>,
    %175 = vector.broadcast %153 : vector<8x1xi32> to vector<8x64xi32>
    %176 = arith.cmpi eq, %5, %175 : vector<8x64xi32>
    %177 = arith.extui %176 : vector<8x64xi1> to vector<8x64xi32>
    %178 = arith.sitofp %177 : vector<8x64xi32> to vector<8x64xf32>
    %179 = tpu.concatenate %178, %124 in 1 : vector<8x64xf32>, vector<8x64xf32> -> vector<8x128xf32>
    %180 = arith.truncf %179 : vector<8x128xf32> to vector<8x128xbf16>
    %cst_55 = arith.constant dense<0.000000e+00> : vector<8x256xf32>
    %181 = tpu.matmul %180, %0, %cst_55 {dimension_numbers = #tpu.dot_dimension_numbers<[1], [0], [0], [1], [0, 0, 1, 1], [], []>} : vector<8x128xbf16>, vector<128x256xbf16>, vector<8x256xf32> -> vector<8x256xf32>
    %182 = vector.broadcast %1 : vector<1x256xf32> to vector<8x256xf32>
    %183 = arith.addf %181, %182 : vector<8x256xf32>
    %184 = vector.extract_strided_slice %183 {offsets = [0, 0], sizes = [8, 64], strides = [1, 1]} : vector<8x256xf32> to vector<8x64xf32>
    %185 = arith.negf %184 : vector<8x64xf32>
    %186 = math.exp %185 : vector<8x64xf32>
    %cst_56 = arith.constant 1.000000e+00 : f32
    %187 = vector.broadcast %cst_56 : f32 to vector<8x64xf32>
    %188 = arith.addf %187, %186 : vector<8x64xf32>
    %189 = arith.divf %187, %188 : vector<8x64xf32>
    %190 = vector.extract_strided_slice %183 {offsets = [0, 64], sizes = [8, 64], strides = [1, 1]} : vector<8x256xf32> to vector<8x64xf32>
    %191 = arith.negf %190 : vector<8x64xf32>
    %192 = math.exp %191 : vector<8x64xf32>
    %cst_57 = arith.constant 1.000000e+00 : f32
    %193 = vector.broadcast %cst_57 : f32 to vector<8x64xf32>
    %194 = arith.addf %193, %192 : vector<8x64xf32>
    %195 = arith.divf %193, %194 : vector<8x64xf32>
    %196 = vector.extract_strided_slice %183 {offsets = [0, 128], sizes = [8, 64], strides = [1, 1]} : vector<8x256xf32> to vector<8x64xf32>
    %197 = math.tanh %196 : vector<8x64xf32>
    %198 = vector.extract_strided_slice %183 {offsets = [0, 192], sizes = [8, 64], strides = [1, 1]} : vector<8x256xf32> to vector<8x64xf32>
    %199 = arith.negf %198 : vector<8x64xf32>
    %200 = math.exp %199 : vector<8x64xf32>
    %cst_58 = arith.constant 1.000000e+00 : f32
    %201 = vector.broadcast %cst_58 : f32 to vector<8x64xf32>
    %202 = arith.addf %201, %200 : vector<8x64xf32>
    %203 = arith.divf %201, %202 : vector<8x64xf32>
    %204 = arith.mulf %195, %122 : vector<8x64xf32>
    %205 = arith.mulf %189, %197 : vector<8x64xf32>
    %206 = arith.addf %204, %205 : vector<8x64xf32>
    %207 = math.tanh %206 : vector<8x64xf32>
    %208 = arith.mulf %203, %207 : vector<8x64xf32>
    %209 = arith.truncf %208 : vector<8x64xf32> to vector<8x64xbf16>
    %cst_59 = arith.constant dense<0.000000e+00> : vector<8x128xf32>
    %210 = tpu.matmul %209, %2, %cst_59 {dimension_numbers = #tpu.dot_dimension_numbers<[1], [0], [0], [1], [0, 0, 1, 1], [], []>} : vector<8x64xbf16>, vector<64x128xbf16>, vector<8x128xf32> -> vector<8x128xf32>
    %211 = vector.broadcast %3 : vector<1x128xf32> to vector<8x128xf32>
    %212 = arith.addf %210, %211 : vector<8x128xf32>
    %cst_60 = arith.constant dense<0xFF800000> : vector<8xf32>
    %213 = vector.multi_reduction <maximumf>, %212, %cst_60 [1] : vector<8x128xf32> to vector<8xf32>
    %214 = vector.shape_cast %213 : vector<8xf32> to vector<8x1xf32>
    %215 = vector.broadcast %214 : vector<8x1xf32> to vector<8x128xf32>
    %216 = arith.subf %212, %215 : vector<8x128xf32>
    %217 = math.exp %216 : vector<8x128xf32>
    %cst_61 = arith.constant dense<0.000000e+00> : vector<8xf32>
    %218 = vector.multi_reduction <add>, %217, %cst_61 [1] : vector<8x128xf32> to vector<8xf32>
    %219 = vector.shape_cast %218 : vector<8xf32> to vector<8x1xf32>
    %220 = vector.broadcast %219 : vector<8x1xf32> to vector<8x128xf32>
    %221 = arith.divf %217, %220 : vector<8x128xf32>
    %222 = vector.broadcast %214 : vector<8x1xf32> to vector<8x128xf32>
    %223 = arith.subf %212, %222 : vector<8x128xf32>
    %224 = math.log %219 : vector<8x1xf32>
    %225 = vector.broadcast %224 : vector<8x1xf32> to vector<8x128xf32>
    %226 = arith.subf %223, %225 : vector<8x128xf32>
    %c2 = arith.constant 2 : index
    %c0_62 = arith.constant 0 : index
    %c0_63 = arith.constant 0 : index
    %227 = vector.load %arg0[%c2, %c0_62, %c0_63] : memref<4x8x128xf32, #tpu.memory_space<vmem>>, vector<1x8x128xf32>
    %228 = vector.shape_cast %227 : vector<1x8x128xf32> to vector<8x128xf32>
    %229 = arith.addf %226, %228 : vector<8x128xf32>
    %cst_64 = arith.constant dense<0xFF800000> : vector<8xf32>
    %230 = vector.multi_reduction <maximumf>, %229, %cst_64 [1] : vector<8x128xf32> to vector<8xf32>
    %231 = vector.shape_cast %230 : vector<8xf32> to vector<8x1xf32>
    %232 = vector.broadcast %231 : vector<8x1xf32> to vector<8x128xf32>
    %233 = arith.cmpf oge, %229, %232 : vector<8x128xf32>
    %c128_i32_65 = arith.constant 128 : i32
    %234 = vector.broadcast %c128_i32_65 : i32 to vector<8x128xi32>
    %235 = arith.select %233, %4, %234 : vector<8x128xi1>, vector<8x128xi32>
    %cst_66 = arith.constant dense<2147483647> : vector<8xi32>
    %236 = vector.multi_reduction <minsi>, %235, %cst_66 [1] : vector<8x128xi32> to vector<8xi32>
    %237 = vector.shape_cast %236 : vector<8xi32> to vector<8x1xi32>
    %238 = vector.broadcast %237 : vector<8x1xi32> to vector<8x128xi32>
    %239 = arith.cmpi eq, %4, %238 : vector<8x128xi32>
    %cst_67 = arith.constant 0.000000e+00 : f32
    %240 = vector.broadcast %cst_67 : f32 to vector<8x128xf32>
    %241 = arith.select %239, %226, %240 : vector<8x128xi1>, vector<8x128xf32>
    %cst_68 = arith.constant dense<0.000000e+00> : vector<8xf32>
    %242 = vector.multi_reduction <add>, %241, %cst_68 [1] : vector<8x128xf32> to vector<8xf32>
    %243 = vector.shape_cast %242 : vector<8xf32> to vector<8x1xf32>
    %244 = arith.mulf %221, %226 : vector<8x128xf32>
    %cst_69 = arith.constant dense<0.000000e+00> : vector<8xf32>
    %245 = vector.multi_reduction <add>, %244, %cst_69 [1] : vector<8x128xf32> to vector<8xf32>
    %246 = vector.shape_cast %245 : vector<8xf32> to vector<8x1xf32>
    %cst_70 = arith.constant 0.000000e+00 : f32
    %247 = vector.broadcast %cst_70 : f32 to vector<8x1xf32>
    %248 = arith.subf %247, %246 : vector<8x1xf32>
    %249 = arith.addf %165, %243 : vector<8x1xf32>
    %250 = arith.addf %166, %248 : vector<8x1xf32>
    %c2_71 = arith.constant 2 : index
    %c0_72 = arith.constant 0 : index
    %c0_73 = arith.constant 0 : index
    %251 = vector.load %arg5[%c2_71, %c0_72, %c0_73] : memref<4x8x128xf32, #tpu.memory_space<vmem>>, vector<1x8x128xf32>
    %252 = vector.shape_cast %251 : vector<1x8x128xf32> to vector<8x128xf32>
    %253 = vector.shape_cast %221 : vector<8x128xf32> to vector<1x8x128xf32>
    tpu.vector_store %arg5[%c2_71, %c0_72, %c0_73], %253 {strides = array<i32>} : memref<4x8x128xf32, #tpu.memory_space<vmem>>, vector<1x8x128xf32>,
    %254 = vector.shape_cast %237 : vector<8x1xi32> to vector<8x1xi32>
    %255 = vector.broadcast %254 : vector<8x1xi32> to vector<8x128xi32>
    %c2_74 = arith.constant 2 : index
    %c0_75 = arith.constant 0 : index
    %c0_76 = arith.constant 0 : index
    %256 = vector.load %arg6[%c2_74, %c0_75, %c0_76] : memref<4x8x128xi32, #tpu.memory_space<vmem>>, vector<1x8x128xi32>
    %257 = vector.shape_cast %256 : vector<1x8x128xi32> to vector<8x128xi32>
    %258 = vector.shape_cast %255 : vector<8x128xi32> to vector<1x8x128xi32>
    tpu.vector_store %arg6[%c2_74, %c0_75, %c0_76], %258 {strides = array<i32>} : memref<4x8x128xi32, #tpu.memory_space<vmem>>, vector<1x8x128xi32>,
    %259 = vector.broadcast %237 : vector<8x1xi32> to vector<8x64xi32>
    %260 = arith.cmpi eq, %5, %259 : vector<8x64xi32>
    %261 = arith.extui %260 : vector<8x64xi1> to vector<8x64xi32>
    %262 = arith.sitofp %261 : vector<8x64xi32> to vector<8x64xf32>
    %263 = tpu.concatenate %262, %208 in 1 : vector<8x64xf32>, vector<8x64xf32> -> vector<8x128xf32>
    %264 = arith.truncf %263 : vector<8x128xf32> to vector<8x128xbf16>
    %cst_77 = arith.constant dense<0.000000e+00> : vector<8x256xf32>
    %265 = tpu.matmul %264, %0, %cst_77 {dimension_numbers = #tpu.dot_dimension_numbers<[1], [0], [0], [1], [0, 0, 1, 1], [], []>} : vector<8x128xbf16>, vector<128x256xbf16>, vector<8x256xf32> -> vector<8x256xf32>
    %266 = vector.broadcast %1 : vector<1x256xf32> to vector<8x256xf32>
    %267 = arith.addf %265, %266 : vector<8x256xf32>
    %268 = vector.extract_strided_slice %267 {offsets = [0, 0], sizes = [8, 64], strides = [1, 1]} : vector<8x256xf32> to vector<8x64xf32>
    %269 = arith.negf %268 : vector<8x64xf32>
    %270 = math.exp %269 : vector<8x64xf32>
    %cst_78 = arith.constant 1.000000e+00 : f32
    %271 = vector.broadcast %cst_78 : f32 to vector<8x64xf32>
    %272 = arith.addf %271, %270 : vector<8x64xf32>
    %273 = arith.divf %271, %272 : vector<8x64xf32>
    %274 = vector.extract_strided_slice %267 {offsets = [0, 64], sizes = [8, 64], strides = [1, 1]} : vector<8x256xf32> to vector<8x64xf32>
    %275 = arith.negf %274 : vector<8x64xf32>
    %276 = math.exp %275 : vector<8x64xf32>
    %cst_79 = arith.constant 1.000000e+00 : f32
    %277 = vector.broadcast %cst_79 : f32 to vector<8x64xf32>
    %278 = arith.addf %277, %276 : vector<8x64xf32>
    %279 = arith.divf %277, %278 : vector<8x64xf32>
    %280 = vector.extract_strided_slice %267 {offsets = [0, 128], sizes = [8, 64], strides = [1, 1]} : vector<8x256xf32> to vector<8x64xf32>
    %281 = math.tanh %280 : vector<8x64xf32>
    %282 = vector.extract_strided_slice %267 {offsets = [0, 192], sizes = [8, 64], strides = [1, 1]} : vector<8x256xf32> to vector<8x64xf32>
    %283 = arith.negf %282 : vector<8x64xf32>
    %284 = math.exp %283 : vector<8x64xf32>
    %cst_80 = arith.constant 1.000000e+00 : f32
    %285 = vector.broadcast %cst_80 : f32 to vector<8x64xf32>
    %286 = arith.addf %285, %284 : vector<8x64xf32>
    %287 = arith.divf %285, %286 : vector<8x64xf32>
    %288 = arith.mulf %279, %206 : vector<8x64xf32>
    %289 = arith.mulf %273, %281 : vector<8x64xf32>
    %290 = arith.addf %288, %289 : vector<8x64xf32>
    %291 = math.tanh %290 : vector<8x64xf32>
    %292 = arith.mulf %287, %291 : vector<8x64xf32>
    %293 = arith.truncf %292 : vector<8x64xf32> to vector<8x64xbf16>
    %cst_81 = arith.constant dense<0.000000e+00> : vector<8x128xf32>
    %294 = tpu.matmul %293, %2, %cst_81 {dimension_numbers = #tpu.dot_dimension_numbers<[1], [0], [0], [1], [0, 0, 1, 1], [], []>} : vector<8x64xbf16>, vector<64x128xbf16>, vector<8x128xf32> -> vector<8x128xf32>
    %295 = vector.broadcast %3 : vector<1x128xf32> to vector<8x128xf32>
    %296 = arith.addf %294, %295 : vector<8x128xf32>
    %cst_82 = arith.constant dense<0xFF800000> : vector<8xf32>
    %297 = vector.multi_reduction <maximumf>, %296, %cst_82 [1] : vector<8x128xf32> to vector<8xf32>
    %298 = vector.shape_cast %297 : vector<8xf32> to vector<8x1xf32>
    %299 = vector.broadcast %298 : vector<8x1xf32> to vector<8x128xf32>
    %300 = arith.subf %296, %299 : vector<8x128xf32>
    %301 = math.exp %300 : vector<8x128xf32>
    %cst_83 = arith.constant dense<0.000000e+00> : vector<8xf32>
    %302 = vector.multi_reduction <add>, %301, %cst_83 [1] : vector<8x128xf32> to vector<8xf32>
    %303 = vector.shape_cast %302 : vector<8xf32> to vector<8x1xf32>
    %304 = vector.broadcast %303 : vector<8x1xf32> to vector<8x128xf32>
    %305 = arith.divf %301, %304 : vector<8x128xf32>
    %306 = vector.broadcast %298 : vector<8x1xf32> to vector<8x128xf32>
    %307 = arith.subf %296, %306 : vector<8x128xf32>
    %308 = math.log %303 : vector<8x1xf32>
    %309 = vector.broadcast %308 : vector<8x1xf32> to vector<8x128xf32>
    %310 = arith.subf %307, %309 : vector<8x128xf32>
    %c3 = arith.constant 3 : index
    %c0_84 = arith.constant 0 : index
    %c0_85 = arith.constant 0 : index
    %311 = vector.load %arg0[%c3, %c0_84, %c0_85] : memref<4x8x128xf32, #tpu.memory_space<vmem>>, vector<1x8x128xf32>
    %312 = vector.shape_cast %311 : vector<1x8x128xf32> to vector<8x128xf32>
    %313 = arith.addf %310, %312 : vector<8x128xf32>
    %cst_86 = arith.constant dense<0xFF800000> : vector<8xf32>
    %314 = vector.multi_reduction <maximumf>, %313, %cst_86 [1] : vector<8x128xf32> to vector<8xf32>
    %315 = vector.shape_cast %314 : vector<8xf32> to vector<8x1xf32>
    %316 = vector.broadcast %315 : vector<8x1xf32> to vector<8x128xf32>
    %317 = arith.cmpf oge, %313, %316 : vector<8x128xf32>
    %c128_i32_87 = arith.constant 128 : i32
    %318 = vector.broadcast %c128_i32_87 : i32 to vector<8x128xi32>
    %319 = arith.select %317, %4, %318 : vector<8x128xi1>, vector<8x128xi32>
    %cst_88 = arith.constant dense<2147483647> : vector<8xi32>
    %320 = vector.multi_reduction <minsi>, %319, %cst_88 [1] : vector<8x128xi32> to vector<8xi32>
    %321 = vector.shape_cast %320 : vector<8xi32> to vector<8x1xi32>
    %322 = vector.broadcast %321 : vector<8x1xi32> to vector<8x128xi32>
    %323 = arith.cmpi eq, %4, %322 : vector<8x128xi32>
    %cst_89 = arith.constant 0.000000e+00 : f32
    %324 = vector.broadcast %cst_89 : f32 to vector<8x128xf32>
    %325 = arith.select %323, %310, %324 : vector<8x128xi1>, vector<8x128xf32>
    %cst_90 = arith.constant dense<0.000000e+00> : vector<8xf32>
    %326 = vector.multi_reduction <add>, %325, %cst_90 [1] : vector<8x128xf32> to vector<8xf32>
    %327 = vector.shape_cast %326 : vector<8xf32> to vector<8x1xf32>
    %328 = arith.mulf %305, %310 : vector<8x128xf32>
    %cst_91 = arith.constant dense<0.000000e+00> : vector<8xf32>
    %329 = vector.multi_reduction <add>, %328, %cst_91 [1] : vector<8x128xf32> to vector<8xf32>
    %330 = vector.shape_cast %329 : vector<8xf32> to vector<8x1xf32>
    %cst_92 = arith.constant 0.000000e+00 : f32
    %331 = vector.broadcast %cst_92 : f32 to vector<8x1xf32>
    %332 = arith.subf %331, %330 : vector<8x1xf32>
    %333 = arith.addf %249, %327 : vector<8x1xf32>
    %334 = arith.addf %250, %332 : vector<8x1xf32>
    %c3_93 = arith.constant 3 : index
    %c0_94 = arith.constant 0 : index
    %c0_95 = arith.constant 0 : index
    %335 = vector.load %arg5[%c3_93, %c0_94, %c0_95] : memref<4x8x128xf32, #tpu.memory_space<vmem>>, vector<1x8x128xf32>
    %336 = vector.shape_cast %335 : vector<1x8x128xf32> to vector<8x128xf32>
    %337 = vector.shape_cast %305 : vector<8x128xf32> to vector<1x8x128xf32>
    tpu.vector_store %arg5[%c3_93, %c0_94, %c0_95], %337 {strides = array<i32>} : memref<4x8x128xf32, #tpu.memory_space<vmem>>, vector<1x8x128xf32>,
    %338 = vector.shape_cast %321 : vector<8x1xi32> to vector<8x1xi32>
    %339 = vector.broadcast %338 : vector<8x1xi32> to vector<8x128xi32>
    %c3_96 = arith.constant 3 : index
    %c0_97 = arith.constant 0 : index
    %c0_98 = arith.constant 0 : index
    %340 = vector.load %arg6[%c3_96, %c0_97, %c0_98] : memref<4x8x128xi32, #tpu.memory_space<vmem>>, vector<1x8x128xi32>
    %341 = vector.shape_cast %340 : vector<1x8x128xi32> to vector<8x128xi32>
    %342 = vector.shape_cast %339 : vector<8x128xi32> to vector<1x8x128xi32>
    tpu.vector_store %arg6[%c3_96, %c0_97, %c0_98], %342 {strides = array<i32>} : memref<4x8x128xi32, #tpu.memory_space<vmem>>, vector<1x8x128xi32>,
    %343 = vector.shape_cast %333 : vector<8x1xf32> to vector<8x1xf32>
    %344 = vector.broadcast %343 : vector<8x1xf32> to vector<8x128xf32>
    %c0_99 = arith.constant 0 : index
    %c0_100 = arith.constant 0 : index
    %345 = vector.load %arg7[%c0_99, %c0_100] : memref<8x128xf32, #tpu.memory_space<vmem>>, vector<8x128xf32>
    tpu.vector_store %arg7[%c0_99, %c0_100], %344 {strides = array<i32>} : memref<8x128xf32, #tpu.memory_space<vmem>>, vector<8x128xf32>,
    %346 = vector.shape_cast %334 : vector<8x1xf32> to vector<8x1xf32>
    %347 = vector.broadcast %346 : vector<8x1xf32> to vector<8x128xf32>
    %c0_101 = arith.constant 0 : index
    %c0_102 = arith.constant 0 : index
    %348 = vector.load %arg8[%c0_101, %c0_102] : memref<8x128xf32, #tpu.memory_space<vmem>>, vector<8x128xf32>
    tpu.vector_store %arg8[%c0_101, %c0_102], %347 {strides = array<i32>} : memref<8x128xf32, #tpu.memory_space<vmem>>, vector<8x128xf32>,
    return
  }
}

</mosaic_0001>

<bundles_post_ra>
// kernel: _forward_impl.1
= control target key start
LH: loop header
LB: loop body
LE: loop exit
PB: predicated region body
PF: predicated region fallthrough
CT: control target
= control target key end

     0   :  { %v1049_v1 = vmov 0   ;;  %v1050_v17 = vmov 0.0|0.0   ;;  %v51_v18 = vlaneseq  ;;  %v1052_v37 = vmov 0.0   ;;  %s1487_s1 = inlined_call_operand.vmem [shape: bf16[128,256], index: 1, kind: input, shape index: {}]   ;;  %s1488_s2 = inlined_call_operand.vmem [shape: f32[1,256], index: 2, kind: input, shape index: {}]   ;;  %s1489_s3 = inlined_call_operand.vmem [shape: bf16[64,128], index: 3, kind: input, shape index: {}]   ;;  %s1490_s4 = inlined_call_operand.vmem [shape: f32[1,128], index: 4, kind: input, shape index: {}]   ;;  %s1491_s0 = inlined_call_operand.vmem [shape: f32[4,8,128], index: 0, kind: input, shape index: {}]   ;;  %s1492_s5 = inlined_call_operand.vmem [shape: f32[4,8,128], index: 5, kind: output, shape index: {0}]   ;;  %s1493_s6 = inlined_call_operand.vmem [shape: s32[4,8,128], index: 6, kind: output, shape index: {1}]   ;;  %s1494_s8 = inlined_call_operand.vmem [shape: f32[8,128], index: 8, kind: output, shape index: {3}]   ;;  %s1495_s7 = inlined_call_operand.vmem [shape: f32[8,128], index: 7, kind: output, shape index: {2}]  }
   0x1   :  { %v1102_v0 = vld [vmem:[%s1487_s1 + $0x4] ss:$8 sps:$4 sm:$0xff]   ;;  %177 = vmatprep.mubr.bf16.mxu0 %v1049_v1  ;;  %v1108_v2 = vld [vmem:[%s1487_s1] ss:$8 sps:$4 sm:$0xff]   ;;  %v1114_v3 = vld [vmem:[%s1487_s1 + $0x14] ss:$8 sps:$4 sm:$0xff]   ;;  %896 = vmatprep.subr.bf16.mxu1 %v1052_v37 }
   0x2   :  { %145 = vmatprep.subr.bf16.mxu0 %v1102_v0  ;;  %v1120_v4 = vld [vmem:[%s1487_s1 + $0x10] ss:$8 sps:$4 sm:$0xff]   ;;  %v1126_v5 = vld [vmem:[%s1487_s1 + $0x24] ss:$8 sps:$4 sm:$0xff]   ;;  %v1132_v6 = vld [vmem:[%s1487_s1 + $0x20] ss:$8 sps:$4 sm:$0xff]  }
   0x3   :  { %146 = vmatpush1.bf16.msra.mxu0 %v1108_v2  ;;  %v1138_v7 = vld [vmem:[%s1487_s1 + $0x34] ss:$8 sps:$4 sm:$0xff]   ;;  %v1144_v8 = vld [vmem:[%s1487_s1 + $0x30] ss:$8 sps:$4 sm:$0xff]   ;;  %v1150_v9 = vld [vmem:[%s1487_s1 + $0x44] ss:$8 sps:$4 sm:$0xff]  }
   0x4   :  { %147 = vmatprep.subr.bf16.mxu0 %v1114_v3  ;;  %v1156_v10 = vld [vmem:[%s1487_s1 + $0x40] ss:$8 sps:$4 sm:$0xff]   ;;  %v1162_v11 = vld [vmem:[%s1487_s1 + $0x54] ss:$8 sps:$4 sm:$0xff]   ;;  %v1168_v12 = vld [vmem:[%s1487_s1 + $0x50] ss:$8 sps:$4 sm:$0xff]  }
   0x5   :  { %v1174_v13 = vld [vmem:[%s1487_s1 + $0x64] ss:$8 sps:$4 sm:$0xff]   ;;  %v1180_v14 = vld [vmem:[%s1487_s1 + $0x60] ss:$8 sps:$4 sm:$0xff]   ;;  %v1186_v15 = vld [vmem:[%s1487_s1 + $0x74] ss:$8 sps:$4 sm:$0xff]  }
   0x6   :  { %v1192_v16 = vld [vmem:[%s1487_s1 + $0x70] ss:$8 sps:$4 sm:$0xff]   ;;  %v56_v19 = vshrl.u32 %v51_v18, 7  ;;  %v41_v21 = vld [vmem:[%s1488_s2] sm:$0x3]  ;;  %s1051_s1 = smov 64  }
   0x7   :  { %148 = vmatpush1.bf16.msra.mxu0 %v1120_v4  ;;  %v1211_v38 = vld [vmem:[%s1489_s3] sm:$0xff]   ;;  %vm1053_vm0 = vmmov 0   ;;  %v1222_v39 = vld [vmem:[%s1489_s3 + $0x8] sm:$0xff]   ;;  %v1231_v40 = vld [vmem:[%s1489_s3 + $0x10] sm:$0xff]   ;;  %vm242_vm1 = vcmask 523264  }
   0x8   :  { %149 = vmatprep.subr.bf16.mxu0 %v1126_v5  ;;  %v57_v20 = vsub.s32 0, %v56_v19  ;;  %v61_v29 = vsub.s32 1, %v56_v19  ;;  %904 = vmatprep.mubr.msk.bf16.mxu1 %vm1053_vm0, %v1052_v37  ;;  %v1240_v41 = vld [vmem:[%s1489_s3 + $0x18] sm:$0xff]   ;;  %v1278_v53 = vld [vmem:[%s1490_s4] ss:$0 sm:$0xff] }
   0x9   :  { %897 = vmatpush3.bf16.msra.mxu1 %v1211_v38 }
   0xa   :  { %v1200_v22 = vrot.slane %v41_v21, %v57_v20  ;;  %v1203_v30 = vrot.slane %v41_v21, %v61_v29  ;;  %898 = vmatprep.subr.bf16.mxu1 %v1052_v37 }
   0xb   :  { %150 = vmatpush1.bf16.msra.mxu0 %v1132_v6 }
   0xc   :  { %151 = vmatprep.subr.bf16.mxu0 %v1138_v7 }
   0xd   :  { %899 = vmatpush3.bf16.msra.mxu1 %v1222_v39 }
   0xe   :  { %900 = vmatprep.subr.bf16.mxu1 %v1052_v37 }
   0xf   :  { %152 = vmatpush1.bf16.msra.mxu0 %v1144_v8 }
  0x10   :  { %153 = vmatprep.subr.bf16.mxu0 %v1150_v9 }
  0x11   :  { %901 = vmatpush3.bf16.msra.mxu1 %v1231_v40 }
  0x12   :  { %902 = vmatprep.subr.bf16.mxu1 %v1052_v37 }
  0x13   :  { %154 = vmatpush1.bf16.msra.mxu0 %v1156_v10 }
  0x14   :  { %155 = vmatprep.subr.bf16.mxu0 %v1162_v11 }
  0x15   :  { %903 = vmatpush3.bf16.msra.mxu1 %v1240_v41 }
  0x16   :  { %334 = vmatprep.subr.bf16.mxu1 %v1102_v0 }
  0x17   :  { %156 = vmatpush1.bf16.msra.mxu0 %v1168_v12 }
  0x18   :  { %157 = vmatprep.subr.bf16.mxu0 %v1174_v13 }
  0x1b   :  { %158 = vmatpush1.bf16.msra.mxu0 %v1180_v14 }
  0x1c   :  { %159 = vmatprep.subr.bf16.mxu0 %v1186_v15 }
  0x1f   :  { %160 = vmatpush1.bf16.msra.mxu0 %v1192_v16 }
  0x20   :  { %908 = vmatprep.subr.bf16.mxu0 %v1052_v37 }
  0x22   :  { %178 = vmatmul.mubr.bf16.vlgmr.msra.gmra.mrb[0].mxu0 %v1050_v17 }
  0x23   :  { %916 = vmatprep.mubr.msk.bf16.mxu0 %vm1053_vm0, %v1052_v37  ;;  %909 = vmatpush3.bf16.msra.mxu0 %v1211_v38 }
  0x24   :  { %910 = vmatprep.subr.bf16.mxu0 %v1052_v37 }
  0x27   :  { %911 = vmatpush3.bf16.msra.mxu0 %v1222_v39 }
  0x28   :  { %912 = vmatprep.subr.bf16.mxu0 %v1052_v37 }
  0x2b   :  { %913 = vmatpush3.bf16.msra.mxu0 %v1231_v40 }
  0x2c   :  { %914 = vmatprep.subr.bf16.mxu0 %v1052_v37 }
  0x2f   :  { %915 = vmatpush3.bf16.msra.mxu0 %v1240_v41 }
  0x30   :  { %495 = vmatprep.subr.bf16.mxu0 %v1102_v0 }
  0xf5   :  { %v179_v23 = vpop.f32.mrb[0].mxu0 }
  0xf6   :  { %v180_v24 = vadd.f32 %v179_v23, %v1200_v22  ;;  %v181_v25 = vpop.f32.mrb[1].mxu0  ;;  %v298_v23 = vld [vmem:[%s1491_s0] sm:$0xff] }
  0xf7   :  { %v183_v26 = vpop.f32.mrb[2].mxu0  ;;  %v182_v31 = vadd.f32 %v181_v25, %v1203_v30 }
  0xf8   :  { %v847_v27 = vmul.f32 -1.442695, %v180_v24  ;;  %v184_v28 = vpop.f32.mrb[3].mxu0  ;;  %v1294_v26 = vand.u32 127, %v51_v18 }
  0xf9   :  { %v848_v42 = vmul.f32 -1.442695, %v182_v31 }
  0xfa   :  { %977 = vpow2.f32 %v847_v27 }
  0xfb   :  { %979 = vtanh.f32 %v182_v31 }
 0x104   :  { %v978_v32 = vpop.eup %977 }
 0x105   :  { %v189_v33 = vadd.f32 1.0, %v978_v32  ;;  %v980_v34 = vpop.eup %979 }
 0x107   :  { %981 = vrcp.f32 %v189_v33 }
 0x108   :  { %983 = vpow2.f32 %v848_v42 }
 0x111   :  { %v982_v35 = vpop.eup %981 }
 0x112   :  { %v200_v36 = vmul.f32 %v982_v35, %v980_v34  ;;  %v984_v43 = vpop.eup %983  ;;  %v199_v45 = vmul.f32 0.0, %v982_v35 }
 0x113   :  { %v196_v44 = vadd.f32 1.0, %v984_v43 }
 0x114   :  { %202 = vrot.lane.b32.xlu0 %v200_v36, %s1051_s1 }
 0x115   :  { %985 = vrcp.f32 %v196_v44 }
 0x11f   :  { %v986_v48 = vpop.eup %985 }
 0x186   :  { %v203_v46 = vpop.permute.xlu0 %202 }
 0x187   :  { %v1249_v47 = vadd.f32 %v203_v46, %v199_v45 }
 0x189   :  { %987 = vtanh.f32 %v1249_v47 }
 0x193   :  { %v988_v49 = vpop.eup %987 }
 0x194   :  { %v1252_v50 = vmul.f32 %v988_v49, %v986_v48 }
 0x196   :  { %v208_v51 = vpack.c.bf16 %v1252_v50, %v1252_v50 }
 0x198   :  { %216 = vrot.lane.b32.xlu0 %v208_v51, %s1051_s1 }
 0x20a   :  { %v217_v52 = vpop.permute.xlu0 %216 }
 0x20b   :  { %905 = vmatmul.mubr.msk.bf16.vlgmr.msra.gmra.mrb[0].mxu1 %vm242_vm1, %v217_v52 }
 0x20c   :  { %335 = vmatpush1.bf16.msra.mxu1 %v1108_v2  ;;  %366 = vmatprep.mubr.bf16.mxu1 %v1049_v1 }
 0x20d   :  { %336 = vmatprep.subr.bf16.mxu1 %v1114_v3 }
 0x210   :  { %337 = vmatpush1.bf16.msra.mxu1 %v1120_v4 }
 0x211   :  { %338 = vmatprep.subr.bf16.mxu1 %v1126_v5 }
 0x214   :  { %339 = vmatpush1.bf16.msra.mxu1 %v1132_v6 }
 0x215   :  { %340 = vmatprep.subr.bf16.mxu1 %v1138_v7 }
 0x218   :  { %341 = vmatpush1.bf16.msra.mxu1 %v1144_v8 }
 0x219   :  { %342 = vmatprep.subr.bf16.mxu1 %v1150_v9 }
 0x21c   :  { %343 = vmatpush1.bf16.msra.mxu1 %v1156_v10 }
 0x21d   :  { %344 = vmatprep.subr.bf16.mxu1 %v1162_v11 }
 0x220   :  { %345 = vmatpush1.bf16.msra.mxu1 %v1168_v12 }
 0x221   :  { %346 = vmatprep.subr.bf16.mxu1 %v1174_v13 }
 0x224   :  { %347 = vmatpush1.bf16.msra.mxu1 %v1180_v14 }
 0x225   :  { %348 = vmatprep.subr.bf16.mxu1 %v1186_v15 }
 0x228   :  { %349 = vmatpush1.bf16.msra.mxu1 %v1192_v16 }
 0x229   :  { %920 = vmatprep.subr.bf16.mxu1 %v1052_v37 }
 0x2de   :  { %v280_v54 = vpop.f32.mrb[0].mxu1 }
 0x2df   :  { %v281_v55 = vadd.f32 %v1278_v53, %v280_v54  ;;  %v906_v56 = vpop.f32.mrb[1].mxu1 }
 0x2e0   :  { %v283_v57 = vpop.f32.mrb[2].mxu1 }
 0x2e1   :  { %286 = vmax.xlane.f32.xlu1 %v281_v55  ;;  %v907_v58 = vpop.f32.mrb[3].mxu1 }
 0x36e   :  { %v287_v59 = vpop.xlane.xlu1 %286 }
 0x36f   :  { %v288_v60 = vsub.f32 %v281_v55, %v287_v59 }
 0x371   :  { %v289_v61 = vmul.f32 1.442695, %v288_v60 }
 0x373   :  { %989 = vpow2.f32 %v289_v61 }
 0x37d   :  { %v990_v62 = vpop.eup %989 }
 0x37e   :  { %291 = vadd.xlane.f32.xlu1 %v990_v62 }
 0x40b   :  { %v292_v63 = vpop.xlane.xlu1 %291 }
 0x40c   :  { %991 = vrcp.f32 %v292_v63 }
 0x40d   :  { %993 = vlog2.f32 %v292_v63 }
 0x416   :  { %v992_v17 = vpop.eup %991 }
 0x417   :  { %v994_v19 = vpop.eup %993  ;;  %v1281_v20 = vmul.f32 %v992_v17, %v990_v62 }
 0x418   :  { %v296_v21 = vmul.f32 0.6931472, %v994_v19 }
 0x419   :  { %328 = vst [vmem:[%s1492_s5] sm:$0xff] %v1281_v20 }
 0x41a   :  { %v1290_v24 = vsub.f32 %v288_v60, %v296_v21 }
 0x41c   :  { %v299_v25 = vadd.f32 %v298_v23, %v1290_v24 }
 0x41e   :  { %300 = vmax.xlane.f32.xlu0 %v299_v25 }
 0x4ab   :  { %v301_v27 = vpop.xlane.xlu0 %300 }
 0x4ac   :  { %vm302_vm2 = vcmp.ge.f32.partialorder %v299_v25, %v301_v27 }
 0x4ad   :  { %v303_v28 = vsel %vm302_vm2, %v1294_v26, 128 }
 0x4ae   :  { %v305_v29 = vshra.s32 %v303_v28, 16  ;;  %v304_v32 = vand.u32 65535, %v303_v28 }
 0x4b0   :  { %v307_v31 = vcvt.s32.f32 %v305_v29  ;;  %v306_v34 = vcvt.s32.f32 %v304_v32 }
 0x4b2   :  { %308 = vmin.xlane.f32.xlu1 %v307_v31 }
 0x53f   :  { %v309_v33 = vpop.xlane.xlu1 %308 }
 0x540   :  { %vm310_vm3 = vcmp.eq.f32.partialorder %v307_v31, %v309_v33  ;;  %v315_v36 = vcvt.f32.s32 %v309_v33 }
 0x541   :  { %v311_v35 = vsel %vm310_vm3, %v306_v34, inf }
 0x542   :  { %312 = vmin.xlane.f32.xlu1 %v311_v35  ;;  %v316_v43 = vshll.u32 %v315_v36, 16 }
 0x5cf   :  { %v313_v42 = vpop.xlane.xlu1 %312 }
 0x5d0   :  { %v314_v44 = vcvt.f32.s32 %v313_v42 }
 0x5d2   :  { %v1297_v45 = vadd.s32 %v316_v43, %v314_v44 }
 0x5d4   :  { %vm318_vm4 = vcmp.eq.s32.totalorder %v1294_v26, %v1297_v45  ;;  %329 = vst [vmem:[%s1493_s6] sm:$0xff] %v1297_v45 }
 0x5d5   :  { %v855_v18 = vsel %vm318_vm4, 1.0, %v1052_v37 }
 0x5d6   :  { %v332_v46 = vsel %vm242_vm1, %v855_v18, %v1252_v50 }
 0x5d7   :  { %v333_v48 = vpack.c.bf16 %v332_v46, %v332_v46 }
 0x5d9   :  { %367 = vmatmul.mubr.bf16.vlgmr.msra.gmra.mrb[4].mxu1 %v333_v48 }
 0x5da   :  { %921 = vmatpush3.bf16.msra.mxu1 %v1211_v38  ;;  %928 = vmatprep.mubr.msk.bf16.mxu1 %vm1053_vm0, %v1052_v37 }
 0x5db   :  { %922 = vmatprep.subr.bf16.mxu1 %v1052_v37 }
 0x5de   :  { %923 = vmatpush3.bf16.msra.mxu1 %v1222_v39 }
 0x5df   :  { %924 = vmatprep.subr.bf16.mxu1 %v1052_v37 }
 0x5e2   :  { %925 = vmatpush3.bf16.msra.mxu1 %v1231_v40 }
 0x5e3   :  { %926 = vmatprep.subr.bf16.mxu1 %v1052_v37 }
 0x5e6   :  { %927 = vmatpush3.bf16.msra.mxu1 %v1240_v41 }
 0x5e7   :  { %656 = vmatprep.subr.bf16.mxu1 %v1102_v0 }
 0x6ac   :  { %v368_v49 = vpop.f32.mrb[4].mxu1 }
 0x6ad   :  { %v369_v50 = vadd.f32 %v368_v49, %v1200_v22  ;;  %v370_v51 = vpop.f32.mrb[5].mxu1 }
 0x6ae   :  { %v372_v52 = vpop.f32.mrb[6].mxu1  ;;  %v371_v56 = vadd.f32 %v370_v51, %v1203_v30 }
 0x6af   :  { %v856_v54 = vmul.f32 -1.442695, %v369_v50  ;;  %v373_v55 = vpop.f32.mrb[7].mxu1  ;;  %v859_v50 = vld [vmem:[%s1491_s0 + $0x8] sm:$0xff] }
 0x6b0   :  { %v857_v0 = vmul.f32 -1.442695, %v371_v56 }
 0x6b1   :  { %995 = vpow2.f32 %v856_v54 }
 0x6b2   :  { %997 = vtanh.f32 %v371_v56 }
 0x6bb   :  { %v996_v57 = vpop.eup %995 }
 0x6bc   :  { %v378_v58 = vadd.f32 1.0, %v996_v57  ;;  %v998_v59 = vpop.eup %997 }
 0x6be   :  { %999 = vrcp.f32 %v378_v58 }
 0x6bf   :  { %1001 = vpow2.f32 %v857_v0 }
 0x6c8   :  { %v1000_v60 = vpop.eup %999 }
 0x6c9   :  { %v389_v61 = vmul.f32 %v1000_v60, %v998_v59  ;;  %v1002_v62 = vpop.eup %1001  ;;  %v388_v17 = vmul.f32 %v1000_v60, %v1249_v47 }
 0x6ca   :  { %v385_v63 = vadd.f32 1.0, %v1002_v62 }
 0x6cb   :  { %391 = vrot.lane.b32.xlu1 %v389_v61, %s1051_s1 }
 0x6cc   :  { %1003 = vrcp.f32 %v385_v63 }
 0x6d6   :  { %v1004_v23 = vpop.eup %1003 }
 0x73d   :  { %v392_v19 = vpop.permute.xlu1 %391 }
 0x73e   :  { %v1325_v21 = vadd.f32 %v392_v19, %v388_v17 }
 0x740   :  { %1005 = vtanh.f32 %v1325_v21 }
 0x74a   :  { %v1006_v25 = vpop.eup %1005 }
 0x74b   :  { %v1328_v27 = vmul.f32 %v1006_v25, %v1004_v23 }
 0x74d   :  { %v397_v28 = vpack.c.bf16 %v1328_v27, %v1328_v27 }
 0x74f   :  { %399 = vrot.lane.b32.xlu1 %v397_v28, %s1051_s1 }
 0x7c1   :  { %v400_v29 = vpop.permute.xlu1 %399 }
 0x7c2   :  { %917 = vmatmul.mubr.msk.bf16.vlgmr.msra.gmra.mrb[4].mxu0 %vm242_vm1, %v400_v29 }
 0x7c3   :  { %496 = vmatpush1.bf16.msra.mxu0 %v1108_v2  ;;  %527 = vmatprep.mubr.bf16.mxu0 %v1049_v1 }
 0x7c4   :  { %497 = vmatprep.subr.bf16.mxu0 %v1114_v3 }
 0x7c7   :  { %498 = vmatpush1.bf16.msra.mxu0 %v1120_v4 }
 0x7c8   :  { %499 = vmatprep.subr.bf16.mxu0 %v1126_v5 }
 0x7cb   :  { %500 = vmatpush1.bf16.msra.mxu0 %v1132_v6 }
 0x7cc   :  { %501 = vmatprep.subr.bf16.mxu0 %v1138_v7 }
 0x7cf   :  { %502 = vmatpush1.bf16.msra.mxu0 %v1144_v8 }
 0x7d0   :  { %503 = vmatprep.subr.bf16.mxu0 %v1150_v9 }
 0x7d3   :  { %504 = vmatpush1.bf16.msra.mxu0 %v1156_v10 }
 0x7d4   :  { %505 = vmatprep.subr.bf16.mxu0 %v1162_v11 }
 0x7d7   :  { %506 = vmatpush1.bf16.msra.mxu0 %v1168_v12 }
 0x7d8   :  { %507 = vmatprep.subr.bf16.mxu0 %v1174_v13 }
 0x7db   :  { %508 = vmatpush1.bf16.msra.mxu0 %v1180_v14 }
 0x7dc   :  { %509 = vmatprep.subr.bf16.mxu0 %v1186_v15 }
 0x7df   :  { %510 = vmatpush1.bf16.msra.mxu0 %v1192_v16 }
 0x7e0   :  { %932 = vmatprep.subr.bf16.mxu0 %v1052_v37 }
 0x895   :  { %v438_v47 = vpop.f32.mrb[4].mxu0 }
 0x896   :  { %v439_v31 = vadd.f32 %v1278_v53, %v438_v47  ;;  %v918_v32 = vpop.f32.mrb[5].mxu0 }
 0x897   :  { %v441_v33 = vpop.f32.mrb[6].mxu0 }
 0x898   :  { %444 = vmax.xlane.f32.xlu1 %v439_v31  ;;  %v919_v34 = vpop.f32.mrb[7].mxu0 }
 0x925   :  { %v445_v35 = vpop.xlane.xlu1 %444 }
 0x926   :  { %v446_v36 = vsub.f32 %v439_v31, %v445_v35 }
 0x928   :  { %v447_v42 = vmul.f32 1.442695, %v446_v36 }
 0x92a   :  { %1007 = vpow2.f32 %v447_v42 }
 0x934   :  { %v1008_v43 = vpop.eup %1007 }
 0x935   :  { %449 = vadd.xlane.f32.xlu0 %v1008_v43 }
 0x9c2   :  { %v450_v44 = vpop.xlane.xlu0 %449 }
 0x9c3   :  { %1009 = vrcp.f32 %v450_v44 }
 0x9c4   :  { %1011 = vlog2.f32 %v450_v44 }
 0x9cd   :  { %v1010_v18 = vpop.eup %1009 }
 0x9ce   :  { %v1012_v46 = vpop.eup %1011  ;;  %v1352_v48 = vmul.f32 %v1010_v18, %v1008_v43 }
 0x9cf   :  { %v454_v49 = vmul.f32 0.6931472, %v1012_v46 }
 0x9d0   :  { %860 = vst [vmem:[%s1492_s5 + $0x8] sm:$0xff] %v1352_v48 }
 0x9d1   :  { %v1361_v51 = vsub.f32 %v446_v36, %v454_v49 }
 0x9d3   :  { %v458_v52 = vadd.f32 %v859_v50, %v1361_v51 }
 0x9d5   :  { %459 = vmax.xlane.f32.xlu0 %v458_v52 }
 0xa62   :  { %v460_v54 = vpop.xlane.xlu0 %459 }
 0xa63   :  { %vm461_vm5 = vcmp.ge.f32.partialorder %v458_v52, %v460_v54 }
 0xa64   :  { %v462_v55 = vsel %vm461_vm5, %v1294_v26, 128 }
 0xa65   :  { %v464_v56 = vshra.s32 %v462_v55, 16  ;;  %v463_v58 = vand.u32 65535, %v462_v55 }
 0xa67   :  { %v466_v57 = vcvt.s32.f32 %v464_v56  ;;  %v465_v60 = vcvt.s32.f32 %v463_v58 }
 0xa69   :  { %467 = vmin.xlane.f32.xlu0 %v466_v57 }
 0xaf6   :  { %v468_v59 = vpop.xlane.xlu0 %467 }
 0xaf7   :  { %vm469_vm6 = vcmp.eq.f32.partialorder %v466_v57, %v468_v59  ;;  %v474_v0 = vcvt.f32.s32 %v468_v59 }
 0xaf8   :  { %v470_v61 = vsel %vm469_vm6, %v465_v60, inf }
 0xaf9   :  { %471 = vmin.xlane.f32.xlu0 %v470_v61  ;;  %v475_v63 = vshll.u32 %v474_v0, 16 }
 0xb86   :  { %v472_v62 = vpop.xlane.xlu0 %471 }
 0xb87   :  { %v473_v17 = vcvt.f32.s32 %v472_v62 }
 0xb89   :  { %v1365_v19 = vadd.s32 %v475_v63, %v473_v17 }
 0xb8b   :  { %vm477_vm7 = vcmp.eq.s32.totalorder %v1294_v26, %v1365_v19  ;;  %861 = vst [vmem:[%s1493_s6 + $0x8] sm:$0xff] %v1365_v19 }
 0xb8c   :  { %v862_v23 = vsel %vm477_vm7, 1.0, %v1052_v37 }
 0xb8d   :  { %v493_v25 = vsel %vm242_vm1, %v862_v23, %v1328_v27 }
 0xb8e   :  { %v494_v28 = vpack.c.bf16 %v493_v25, %v493_v25 }
 0xb90   :  { %528 = vmatmul.mubr.bf16.vlgmr.msra.gmra.mrb[8].mxu0 %v494_v28 }
 0xb91   :  { %933 = vmatpush3.bf16.msra.mxu0 %v1211_v38  ;;  %940 = vmatprep.mubr.msk.bf16.mxu0 %vm1053_vm0, %v1052_v37 }
 0xb92   :  { %934 = vmatprep.subr.bf16.mxu0 %v1052_v37 }
 0xb95   :  { %935 = vmatpush3.bf16.msra.mxu0 %v1222_v39 }
 0xb96   :  { %936 = vmatprep.subr.bf16.mxu0 %v1052_v37 }
 0xb99   :  { %937 = vmatpush3.bf16.msra.mxu0 %v1231_v40 }
 0xb9a   :  { %938 = vmatprep.subr.bf16.mxu0 %v1052_v37 }
 0xb9d   :  { %939 = vmatpush3.bf16.msra.mxu0 %v1240_v41 }
 0xc63   :  { %v529_v27 = vpop.f32.mrb[8].mxu0 }
 0xc64   :  { %v530_v29 = vadd.f32 %v529_v27, %v1200_v22  ;;  %v531_v47 = vpop.f32.mrb[9].mxu0 }
 0xc65   :  { %v533_v38 = vpop.f32.mrb[10].mxu0  ;;  %v532_v33 = vadd.f32 %v531_v47, %v1203_v30 }
 0xc66   :  { %v863_v31 = vmul.f32 -1.442695, %v530_v29  ;;  %v534_v32 = vpop.f32.mrb[11].mxu0 }
 0xc67   :  { %v864_v41 = vmul.f32 -1.442695, %v532_v33 }
 0xc68   :  { %1013 = vpow2.f32 %v863_v31 }
 0xc69   :  { %1015 = vtanh.f32 %v532_v33 }
 0xc72   :  { %v1014_v34 = vpop.eup %1013 }
 0xc73   :  { %v539_v39 = vadd.f32 1.0, %v1014_v34  ;;  %v1016_v35 = vpop.eup %1015 }
 0xc75   :  { %1017 = vrcp.f32 %v539_v39 }
 0xc76   :  { %1019 = vpow2.f32 %v864_v41 }
 0xc7f   :  { %v1018_v40 = vpop.eup %1017 }
 0xc80   :  { %v550_v36 = vmul.f32 %v1018_v40, %v1016_v35  ;;  %v1020_v42 = vpop.eup %1019  ;;  %v549_v44 = vmul.f32 %v1018_v40, %v1325_v21 }
 0xc81   :  { %v546_v43 = vadd.f32 1.0, %v1020_v42 }
 0xc82   :  { %552 = vrot.lane.b32.xlu0 %v550_v36, %s1051_s1 }
 0xc83   :  { %1021 = vrcp.f32 %v546_v43 }
 0xc8d   :  { %v1022_v49 = vpop.eup %1021 }
 0xcf4   :  { %v553_v18 = vpop.permute.xlu0 %552 }
 0xcf5   :  { %v1392_v46 = vadd.f32 %v553_v18, %v549_v44 }
 0xcf7   :  { %1023 = vtanh.f32 %v1392_v46 }
 0xd01   :  { %v1024_v50 = vpop.eup %1023 }
 0xd02   :  { %v1395_v52 = vmul.f32 %v1024_v50, %v1022_v49 }
 0xd04   :  { %v558_v54 = vpack.c.bf16 %v1395_v52, %v1395_v52 }
 0xd06   :  { %560 = vrot.lane.b32.xlu1 %v558_v54, %s1051_s1 }
 0xd78   :  { %v561_v55 = vpop.permute.xlu1 %560 }
 0xd79   :  { %929 = vmatmul.mubr.msk.bf16.vlgmr.msra.gmra.mrb[8].mxu1 %vm242_vm1, %v561_v55 }
 0xd7a   :  { %657 = vmatpush1.bf16.msra.mxu1 %v1108_v2  ;;  %688 = vmatprep.mubr.bf16.mxu1 %v1049_v1 }
 0xd7b   :  { %658 = vmatprep.subr.bf16.mxu1 %v1114_v3 }
 0xd7e   :  { %659 = vmatpush1.bf16.msra.mxu1 %v1120_v4 }
 0xd7f   :  { %660 = vmatprep.subr.bf16.mxu1 %v1126_v5 }
 0xd82   :  { %661 = vmatpush1.bf16.msra.mxu1 %v1132_v6 }
 0xd83   :  { %662 = vmatprep.subr.bf16.mxu1 %v1138_v7 }
 0xd86   :  { %663 = vmatpush1.bf16.msra.mxu1 %v1144_v8 }
 0xd87   :  { %664 = vmatprep.subr.bf16.mxu1 %v1150_v9 }
 0xd8a   :  { %665 = vmatpush1.bf16.msra.mxu1 %v1156_v10 }
 0xd8b   :  { %666 = vmatprep.subr.bf16.mxu1 %v1162_v11 }
 0xd8e   :  { %667 = vmatpush1.bf16.msra.mxu1 %v1168_v12 }
 0xd8f   :  { %668 = vmatprep.subr.bf16.mxu1 %v1174_v13 }
 0xd92   :  { %669 = vmatpush1.bf16.msra.mxu1 %v1180_v14 }
 0xd93   :  { %670 = vmatprep.subr.bf16.mxu1 %v1186_v15  ;;  %v866_v15 = vld [vmem:[%s1491_s0 + $0x10] sm:$0xff] }
 0xd96   :  { %671 = vmatpush1.bf16.msra.mxu1 %v1192_v16 }
 0xe4c   :  { %v599_v1 = vpop.f32.mrb[8].mxu1 }
 0xe4d   :  { %v600_v2 = vadd.f32 %v1278_v53, %v599_v1  ;;  %v930_v3 = vpop.f32.mrb[9].mxu1 }
 0xe4e   :  { %v602_v4 = vpop.f32.mrb[10].mxu1 }
 0xe4f   :  { %605 = vmax.xlane.f32.xlu0 %v600_v2  ;;  %v931_v5 = vpop.f32.mrb[11].mxu1 }
 0xedc   :  { %v606_v6 = vpop.xlane.xlu0 %605 }
 0xedd   :  { %v607_v7 = vsub.f32 %v600_v2, %v606_v6 }
 0xedf   :  { %v608_v8 = vmul.f32 1.442695, %v607_v7 }
 0xee1   :  { %1025 = vpow2.f32 %v608_v8 }
 0xeeb   :  { %v1026_v9 = vpop.eup %1025 }
 0xeec   :  { %610 = vadd.xlane.f32.xlu1 %v1026_v9 }
 0xf79   :  { %v611_v10 = vpop.xlane.xlu1 %610 }
 0xf7a   :  { %1027 = vrcp.f32 %v611_v10 }
 0xf7b   :  { %1029 = vlog2.f32 %v611_v10 }
 0xf84   :  { %v1028_v11 = vpop.eup %1027 }
 0xf85   :  { %v1030_v12 = vpop.eup %1029  ;;  %v1418_v13 = vmul.f32 %v1028_v11, %v1026_v9 }
 0xf86   :  { %v615_v14 = vmul.f32 0.6931472, %v1030_v12 }
 0xf87   :  { %867 = vst [vmem:[%s1492_s5 + $0x10] sm:$0xff] %v1418_v13 }
 0xf88   :  { %v1427_v16 = vsub.f32 %v607_v7, %v615_v14 }
 0xf8a   :  { %v619_v21 = vadd.f32 %v866_v15, %v1427_v16 }
 0xf8c   :  { %620 = vmax.xlane.f32.xlu0 %v619_v21 }
0x1019   :  { %v621_v56 = vpop.xlane.xlu0 %620 }
0x101a   :  { %vm622_vm8 = vcmp.ge.f32.partialorder %v619_v21, %v621_v56 }
0x101b   :  { %v623_v57 = vsel %vm622_vm8, %v1294_v26, 128 }
0x101c   :  { %v625_v58 = vshra.s32 %v623_v57, 16  ;;  %v624_v60 = vand.u32 65535, %v623_v57 }
0x101e   :  { %v627_v59 = vcvt.s32.f32 %v625_v58  ;;  %v626_v0 = vcvt.s32.f32 %v624_v60 }
0x1020   :  { %628 = vmin.xlane.f32.xlu0 %v627_v59 }
0x10ad   :  { %v629_v61 = vpop.xlane.xlu0 %628 }
0x10ae   :  { %vm630_vm9 = vcmp.eq.f32.partialorder %v627_v59, %v629_v61  ;;  %v635_v63 = vcvt.f32.s32 %v629_v61  ;;  %v322_v61 = vmul.f32 %v1290_v24, %v1281_v20  ;;  %v481_v20 = vmul.f32 %v1361_v51, %v1352_v48 }
0x10af   :  { %v631_v62 = vsel %vm630_vm9, %v626_v0, inf  ;;  %v319_v0 = vsel %vm318_vm4, %v1290_v24, 0.0  ;;  %v478_v24 = vsel %vm477_vm7, %v1361_v51, 0.0 }
0x10b0   :  { %632 = vmin.xlane.f32.xlu0 %v631_v62  ;;  %v636_v23 = vshll.u32 %v635_v63, 16  ;;  %v642_v62 = vmul.f32 %v1427_v16, %v1418_v13 }
0x113d   :  { %v633_v17 = vpop.xlane.xlu0 %632 }
0x113e   :  { %v634_v25 = vcvt.f32.s32 %v633_v17 }
0x1140   :  { %v1431_v28 = vadd.s32 %v636_v23, %v634_v25 }
0x1142   :  { %vm638_vm10 = vcmp.eq.s32.totalorder %v1294_v26, %v1431_v28  ;;  %868 = vst [vmem:[%s1493_s6 + $0x10] sm:$0xff] %v1431_v28 }
0x1143   :  { %v869_v27 = vsel %vm638_vm10, 1.0, %v1052_v37  ;;  %v639_v45 = vsel %vm638_vm10, %v1427_v16, 0.0 }
0x1144   :  { %v654_v29 = vsel %vm242_vm1, %v869_v27, %v1395_v52 }
0x1145   :  { %v655_v47 = vpack.c.bf16 %v654_v29, %v654_v29 }
0x1147   :  { %689 = vmatmul.mubr.bf16.vlgmr.msra.gmra.mrb[12].mxu1 %v655_v47 }
0x121a   :  { %v690_v38 = vpop.f32.mrb[12].mxu1 }
0x121b   :  { %v691_v31 = vadd.f32 %v690_v38, %v1200_v22  ;;  %v692_v32 = vpop.f32.mrb[13].mxu1 }
0x121c   :  { %v694_v33 = vpop.f32.mrb[14].mxu1  ;;  %v693_v35 = vadd.f32 %v692_v32, %v1203_v30 }
0x121d   :  { %v870_v34 = vmul.f32 -1.442695, %v691_v31  ;;  %v695_v39 = vpop.f32.mrb[15].mxu1 }
0x121e   :  { %v871_v43 = vmul.f32 -1.442695, %v693_v35 }
0x121f   :  { %1031 = vpow2.f32 %v870_v34 }
0x1220   :  { %1033 = vtanh.f32 %v693_v35 }
0x1229   :  { %v1032_v40 = vpop.eup %1031 }
0x122a   :  { %v700_v36 = vadd.f32 1.0, %v1032_v40  ;;  %v1034_v37 = vpop.eup %1033 }
0x122c   :  { %1035 = vrcp.f32 %v700_v36 }
0x122d   :  { %1037 = vpow2.f32 %v871_v43 }
0x1236   :  { %v1036_v41 = vpop.eup %1035 }
0x1237   :  { %v711_v42 = vmul.f32 %v1036_v41, %v1034_v37  ;;  %v1038_v44 = vpop.eup %1037  ;;  %v710_v18 = vmul.f32 %v1036_v41, %v1392_v46 }
0x1238   :  { %v707_v22 = vadd.f32 1.0, %v1038_v44 }
0x1239   :  { %713 = vrot.lane.b32.xlu0 %v711_v42, %s1051_s1 }
0x123a   :  { %1039 = vrcp.f32 %v707_v22 }
0x1244   :  { %v1040_v30 = vpop.eup %1039 }
0x12ab   :  { %v714_v49 = vpop.permute.xlu0 %713 }
0x12ac   :  { %v716_v50 = vadd.f32 %v714_v49, %v710_v18 }
0x12ae   :  { %1041 = vtanh.f32 %v716_v50 }
0x12b8   :  { %v1042_v52 = vpop.eup %1041 }
0x12b9   :  { %v718_v54 = vmul.f32 %v1042_v52, %v1040_v30 }
0x12bb   :  { %v719_v55 = vpack.c.bf16 %v718_v54, %v718_v54 }
0x12bd   :  { %721 = vrot.lane.b32.xlu1 %v719_v55, %s1051_s1 }
0x132f   :  { %v722_v1 = vpop.permute.xlu1 %721 }
0x1330   :  { %941 = vmatmul.mubr.msk.bf16.vlgmr.msra.gmra.mrb[12].mxu0 %vm242_vm1, %v722_v1 }
0x1403   :  { %v760_v2 = vpop.f32.mrb[12].mxu0 }
0x1404   :  { %v761_v3 = vadd.f32 %v1278_v53, %v760_v2  ;;  %v942_v4 = vpop.f32.mrb[13].mxu0  ;;  %v873_v53 = vld [vmem:[%s1491_s0 + $0x18] sm:$0xff] }
0x1405   :  { %v763_v5 = vpop.f32.mrb[14].mxu0 }
0x1406   :  { %766 = vmax.xlane.f32.xlu0 %v761_v3  ;;  %v943_v46 = vpop.f32.mrb[15].mxu0 }
0x1493   :  { %v767_v6 = vpop.xlane.xlu0 %766 }
0x1494   :  { %v768_v7 = vsub.f32 %v761_v3, %v767_v6 }
0x1496   :  { %v769_v8 = vmul.f32 1.442695, %v768_v7 }
0x1498   :  { %1043 = vpow2.f32 %v769_v8 }
0x14a2   :  { %v1044_v9 = vpop.eup %1043 }
0x14a3   :  { %771 = vadd.xlane.f32.xlu1 %v1044_v9 }
0x1530   :  { %v772_v10 = vpop.xlane.xlu1 %771 }
0x1531   :  { %1045 = vrcp.f32 %v772_v10 }
0x1532   :  { %1047 = vlog2.f32 %v772_v10 }
0x153b   :  { %v1046_v11 = vpop.eup %1045 }
0x153c   :  { %v1048_v12 = vpop.eup %1047  ;;  %v774_v14 = vmul.f32 %v1046_v11, %v1044_v9 }
0x153d   :  { %v776_v15 = vmul.f32 0.6931472, %v1048_v12 }
0x153e   :  { %874 = vst [vmem:[%s1492_s5 + $0x18] sm:$0xff] %v774_v14 }
0x153f   :  { %v777_v21 = vsub.f32 %v768_v7, %v776_v15 }
0x1541   :  { %v780_v56 = vadd.f32 %v873_v53, %v777_v21  ;;  %v803_v63 = vmul.f32 %v777_v21, %v774_v14 }
0x1543   :  { %781 = vmax.xlane.f32.xlu0 %v780_v56 }
0x15d0   :  { %v782_v57 = vpop.xlane.xlu0 %781 }
0x15d1   :  { %vm783_vm11 = vcmp.ge.f32.partialorder %v780_v56, %v782_v57 }
0x15d2   :  { %v784_v58 = vsel %vm783_vm11, %v1294_v26, 128 }
0x15d3   :  { %v786_v59 = vshra.s32 %v784_v58, 16  ;;  %v785_v17 = vand.u32 65535, %v784_v58 }
0x15d5   :  { %v788_v60 = vcvt.s32.f32 %v786_v59  ;;  %v787_v25 = vcvt.s32.f32 %v785_v17 }
0x15d7   :  { %789 = vmin.xlane.f32.xlu0 %v788_v60 }
0x15db   :  { %323 = vadd.xlane.f32.xlu0 %v322_v61 }
0x15df   :  { %320 = vadd.xlane.f32.xlu0 %v319_v0 }
0x15e3   :  { %643 = vadd.xlane.f32.xlu0 %v642_v62 }
0x15e7   :  { %804 = vadd.xlane.f32.xlu0 %v803_v63 }
0x1664   :  { %v790_v23 = vpop.xlane.xlu0 %789 }
0x1665   :  { %vm791_vm12 = vcmp.eq.f32.partialorder %v788_v60, %v790_v23  ;;  %v796_v47 = vcvt.f32.s32 %v790_v23 }
0x1666   :  { %v792_v27 = vsel %vm791_vm12, %v787_v25, inf }
0x1667   :  { %793 = vmin.xlane.f32.xlu1 %v792_v27  ;;  %v797_v32 = vshll.u32 %v796_v47, 16 }
0x1668   :  { %v324_v13 = vpop.xlane.xlu0 %323 }
0x1669   :  { %v325_v39 = vsub.f32 0.0, %v324_v13 }
0x166b   :  { %482 = vadd.xlane.f32.xlu1 %v481_v20 }
0x166c   :  { %v321_v29 = vpop.xlane.xlu0 %320 }
0x166f   :  { %479 = vadd.xlane.f32.xlu1 %v478_v24 }
0x1670   :  { %v644_v38 = vpop.xlane.xlu0 %643 }
0x1671   :  { %v645_v28 = vsub.f32 0.0, %v644_v38 }
0x1673   :  { %640 = vadd.xlane.f32.xlu1 %v639_v45 }
0x1674   :  { %v805_v19 = vpop.xlane.xlu0 %804 }
0x1675   :  { %v806_v40 = vsub.f32 0.0, %v805_v19 }
0x16f4   :  { %v794_v31 = vpop.xlane.xlu1 %793 }
0x16f5   :  { %v795_v48 = vcvt.f32.s32 %v794_v31 }
0x16f7   :  { %v798_v33 = vadd.s32 %v797_v32, %v795_v48 }
0x16f8   :  { %v483_v34 = vpop.xlane.xlu1 %482 }
0x16f9   :  { %875 = vst [vmem:[%s1493_s6 + $0x18] sm:$0xff] %v798_v33  ;;  %v484_v51 = vsub.f32 0.0, %v483_v34  ;;  %vm799_vm13 = vcmp.eq.s32.totalorder %v1294_v26, %v798_v33 }
0x16fa   :  { %v800_v16 = vsel %vm799_vm13, %v777_v21, 0.0 }
0x16fb   :  { %v486_v35 = vadd.f32 %v484_v51, %v325_v39  ;;  %801 = vadd.xlane.f32.xlu1 %v800_v16 }
0x16fc   :  { %v480_v41 = vpop.xlane.xlu1 %479 }
0x16fd   :  { %v647_v36 = vadd.f32 %v645_v28, %v486_v35  ;;  %v485_v43 = vadd.f32 %v480_v41, %v321_v29 }
0x16ff   :  { %v808_v37 = vadd.f32 %v806_v40, %v647_v36 }
0x1700   :  { %v641_v42 = vpop.xlane.xlu1 %640 }
0x1701   :  { %814 = vst [vmem:[%s1494_s8] sm:$0xff] %v808_v37  ;;  %v646_v44 = vadd.f32 %v641_v42, %v485_v43 }
0x1788   :  { %v802_v22 = vpop.xlane.xlu1 %801 }
0x1789   :  { %v807_v18 = vadd.f32 %v802_v22, %v646_v44 }
0x178b   :  { %813 = vst [vmem:[%s1495_s7] sm:$0xff] %v807_v18 }

</bundles_post_ra>
